<compile_context>
chip_gen: v5e
topology: v5e:2x2
jax: 0.10.0
libtpu: 0.0.40
codegen_flags: <defaults>
</compile_context>

<pallas_src>
import functools

import jax
import jax.numpy as jnp
from jax.experimental import pallas as pl
from jax.experimental.pallas import tpu as pltpu


def _generator_kernel(x_ref, w1_ref, b1_ref, w2_ref, b2_ref, u_ref, o_ref,
                      *, neg_inv_temperature, eps):
    # All tensors are transposed: rows (M) on lanes, features on sublanes.
    x = x_ref[...].astype(w1_ref.dtype)                       # (F, tm)

    # h^T = relu(W1^T @ x^T + b1)                              -> (H, tm)
    h = jnp.dot(w1_ref[...], x, preferred_element_type=jnp.float32) + b1_ref[...]
    h = jnp.maximum(h, 0.0)

    # logits^T / T = (W2^T/T) @ h^T + b2/T  (1/T pre-folded)    -> (D, tm)
    logits = jnp.dot(w2_ref[...], h.astype(w2_ref.dtype),
                     preferred_element_type=jnp.float32) + b2_ref[...]

    # Gumbel noise scaled by 1/T:  (-1/T) * log(-log(u + eps) + eps)
    u = u_ref[...]                                            # (D, tm) f32
    y = logits + neg_inv_temperature * jnp.log(-jnp.log(u + eps) + eps)

    # Softmax over the dictionary axis (sublane axis, D=16 -> 2 f32 groups).
    y = y - jnp.max(y, axis=0, keepdims=True)
    e = jnp.exp(y)
    o_ref[...] = (e / jnp.sum(e, axis=0, keepdims=True)).astype(o_ref.dtype)


def _choose_tiling(M, block_rows):
    """Pick (tm, Mp, steps): tm multiple of 128, low pad waste, >=2 steps
    when M is big enough so the v7x megacore can split the row axis."""
    nb = pl.cdiv(M, 128)                     # 128-row lane blocks needed
    max_blocks_per_tile = max(1, block_rows // 128)
    steps = pl.cdiv(nb, max_blocks_per_tile)
    if steps == 1 and nb >= 2:
        steps = 2                            # engage both TCs on v7x
    blocks_per_tile = pl.cdiv(nb, steps)
    tm = blocks_per_tile * 128
    Mp = steps * tm
    return tm, Mp, steps


def linear_generator_forward(x, w1, b1, w2, b2, key=None, temperature=0.9,
                             *, block_rows=2048, matmul_dtype=jnp.float32,
                             uniform_noise=None):
    """x: (B, L, F) -> soft_prob: (B, L, D), Gumbel-softmax over the dict axis.

    `uniform_noise` (optional): U[0,1) noise of shape (B, L, D) for exact
    reproducibility / testing.  Otherwise noise is drawn from `key`.
    """
    eps = 1e-20
    B, L, F = x.shape
    M = B * L
    H = w1.shape[1]
    D = w2.shape[1]
    inv_t = float(1.0 / temperature)

    tm, Mp, _steps = _choose_tiling(M, block_rows)

    # --- layout plumbing (wrapper side): row-major -> lane-dense transposed.
    x2 = x.reshape(M, F).astype(jnp.float32)
    if Mp != M:
        x2 = jnp.pad(x2, ((0, Mp - M), (0, 0)))
    xT = x2.T                                        # (F, Mp), rows on lanes

    w1t = w1.T.astype(matmul_dtype)                  # (H, F)
    b1c = b1.reshape(H, 1).astype(jnp.float32)       # (H, 1)
    w2t = (w2.T * inv_t).astype(matmul_dtype)        # (D, H), 1/T folded in
    b2c = (b2.reshape(D, 1) * inv_t).astype(jnp.float32)

    if uniform_noise is None:
        if key is None:
            raise ValueError("need `key` when `uniform_noise` is not given")
        u = jax.random.uniform(key, (D, Mp), jnp.float32)
    else:
        uT = uniform_noise.reshape(M, D).T.astype(jnp.float32)   # (D, M)
        u = jnp.pad(uT, ((0, 0), (0, Mp - M)), constant_values=0.5)

    kern = functools.partial(_generator_kernel,
                             neg_inv_temperature=-inv_t, eps=eps)

    itemsize = jnp.dtype(matmul_dtype).itemsize
    cost = pl.CostEstimate(
        flops=2 * Mp * (F * H + H * D),
        transcendentals=3 * Mp * D,                  # 2 log + 1 exp per elem
        bytes_accessed=(Mp * F * 4                   # xT (f32)
                        + (F * H + H * D) * itemsize + (H + D) * 4
                        + Mp * D * 4                 # uniform noise
                        + Mp * D * 4))               # output

    out_t = pl.pallas_call(
        kern,
        out_shape=jax.ShapeDtypeStruct((D, Mp), jnp.float32),
        grid=(Mp // tm,),
        in_specs=[
            pl.BlockSpec((F, tm), lambda i: (0, i)),   # x columns (pipelined)
            pl.BlockSpec((H, F), lambda i: (0, 0)),    # W1^T (VMEM resident)
            pl.BlockSpec((H, 1), lambda i: (0, 0)),    # b1
            pl.BlockSpec((D, H), lambda i: (0, 0)),    # W2^T / T
            pl.BlockSpec((D, 1), lambda i: (0, 0)),    # b2 / T
            pl.BlockSpec((D, tm), lambda i: (0, i)),   # uniform noise
        ],
        out_specs=pl.BlockSpec((D, tm), lambda i: (0, i)),
        compiler_params=pltpu.CompilerParams(
            dimension_semantics=("parallel",),
            vmem_limit_bytes=32 * 1024 * 1024),
        cost_estimate=cost,
    )(xT, w1t, b1c, w2t, b2c, u)

    return out_t[:, :M].T.reshape(B, L, D)


# ---------------------------------------------------------------------------
# Reference + test harness
# ---------------------------------------------------------------------------

def _init_linear(key, fan_in, fan_out):
    # Mimics torch.nn.Linear's uniform(-1/sqrt(fan_in), 1/sqrt(fan_in)) init.
    kw, kb = jax.random.split(key)
    bound = 1.0 / jnp.sqrt(jnp.float32(fan_in))
    w = jax.random.uniform(kw, (fan_in, fan_out), jnp.float32, -bound, bound)
    b = jax.random.uniform(kb, (fan_out,), jnp.float32, -bound, bound)
    return w, b


def _reference_forward(x, w1, b1, w2, b2, uniform_noise, temperature, eps=1e-20):
    B, L, F = x.shape
    D = w2.shape[1]
    h = jnp.maximum(x.reshape(B * L, F) @ w1 + b1.reshape(1, -1), 0.0)
    logits = h @ w2 + b2.reshape(1, -1)
    g = -jnp.log(-jnp.log(uniform_noise.reshape(B * L, D) + eps) + eps)
    y = (logits + g) / temperature
    return jax.nn.softmax(y, axis=-1).reshape(B, L, D)


def _sanity(soft_prob, B, L, D):
    assert soft_prob.shape == (B, L, D)
    assert bool(jnp.all(jnp.isfinite(soft_prob)))
    assert bool(jnp.all(soft_prob >= 0.0))
    assert bool(jnp.all(soft_prob <= 1.0 + 1e-6))
    assert jnp.allclose(jnp.sum(soft_prob, axis=-1), 1.0, atol=1e-5)


if __name__ == "__main__":
    # GanConfig-ish hyperparameters (small, consistent with the module).
    concat_window = 3
    encoder_element_size = 8
    gen_hidden_size = 32
    dictionary_size = 16
    z_size = 0                                   # forward() assumes z_size == 0
    n_feature = concat_window * encoder_element_size + z_size   # 24
    temperature = 0.9

    key = jax.random.PRNGKey(0)
    k_x, k_l1, k_l2, k_u, k_x2, k_noise2 = jax.random.split(key, 6)

    w1, b1 = _init_linear(k_l1, n_feature, gen_hidden_size)
    w2, b2 = _init_linear(k_l2, gen_hidden_size, dictionary_size)

    # Small shape: batch=2, phrase_length=8 -> M=16 rows, single grid step.
    batch, phrase_length = 2, 8
    x = jax.random.normal(k_x, (batch, phrase_length, n_feature), jnp.float32)
    u_small = jax.random.uniform(
        k_u, (batch, phrase_length, dictionary_size), jnp.float32)

    out = linear_generator_forward(x, w1, b1, w2, b2,
                                   temperature=temperature,
                                   uniform_noise=u_small)
    jax.block_until_ready(out)
    _sanity(out, batch, phrase_length, dictionary_size)
    ref = _reference_forward(x, w1, b1, w2, b2, u_small, temperature)
    assert jnp.allclose(out, ref, atol=1e-4, rtol=1e-3), \
        float(jnp.max(jnp.abs(out - ref)))

    # Bigger shape exercising the tiled/pipelined path: M=600 -> tm=384, grid=(2,).
    batch2, phrase_length2 = 3, 200
    x_big = jax.random.normal(k_x2, (batch2, phrase_length2, n_feature),
                              jnp.float32)
    out_big = linear_generator_forward(x_big, w1, b1, w2, b2, key=k_noise2,
                                       temperature=temperature)
    jax.block_until_ready(out_big)
    _sanity(out_big, batch2, phrase_length2, dictionary_size)

    print("KERNEL_OK")
</pallas_src>

<mosaic_0001>
module attributes {stable_mosaic.version = 11 : i64} {
  func.func @_generator_kernel(%arg0: i32, %arg1: memref<24x128xf32, #tpu.memory_space<vmem>>, %arg2: memref<32x24xf32, #tpu.memory_space<vmem>>, %arg3: memref<32x1xf32, #tpu.memory_space<vmem>>, %arg4: memref<16x32xf32, #tpu.memory_space<vmem>>, %arg5: memref<16x1xf32, #tpu.memory_space<vmem>>, %arg6: memref<16x128xf32, #tpu.memory_space<vmem>>, %arg7: memref<16x128xf32, #tpu.memory_space<vmem>>) attributes {dimension_semantics = [#tpu.dimension_semantics<parallel>], iteration_bounds = array<i64: 1>, scalar_prefetch = 0 : i64, scratch_operands = 0 : i64, tpu.core_type = #tpu.core_type<tc>, window_params = [{transform_indices = @transform_0, window_bounds = array<i64: 24, 128>}, {pipeline_mode = #tpu.pipeline_mode<synchronous>, transform_indices = @transform_1, window_bounds = array<i64: 32, 24>}, {pipeline_mode = #tpu.pipeline_mode<synchronous>, transform_indices = @transform_2, window_bounds = array<i64: 32, 1>}, {pipeline_mode = #tpu.pipeline_mode<synchronous>, transform_indices = @transform_3, window_bounds = array<i64: 16, 32>}, {pipeline_mode = #tpu.pipeline_mode<synchronous>, transform_indices = @transform_4, window_bounds = array<i64: 16, 1>}, {transform_indices = @transform_5, window_bounds = array<i64: 16, 128>}, {transform_indices = @transform_6, window_bounds = array<i64: 16, 128>}]} {
    %c0 = arith.constant 0 : index
    %c0_0 = arith.constant 0 : index
    %0 = vector.load %arg1[%c0, %c0_0] : memref<24x128xf32, #tpu.memory_space<vmem>>, vector<24x128xf32>
    %c0_1 = arith.constant 0 : index
    %c0_2 = arith.constant 0 : index
    %1 = vector.load %arg2[%c0_1, %c0_2] : memref<32x24xf32, #tpu.memory_space<vmem>>, vector<32x24xf32>
    %cst = arith.constant dense<0.000000e+00> : vector<32x128xf32>
    %2 = tpu.matmul %1, %0, %cst {dimension_numbers = #tpu.dot_dimension_numbers<[1], [0], [0], [1], [0, 0, 1, 1], [], []>} : vector<32x24xf32>, vector<24x128xf32>, vector<32x128xf32> -> vector<32x128xf32>
    %c0_3 = arith.constant 0 : index
    %c0_4 = arith.constant 0 : index
    %3 = vector.load %arg3[%c0_3, %c0_4] : memref<32x1xf32, #tpu.memory_space<vmem>>, vector<32x1xf32>
    %4 = vector.broadcast %3 : vector<32x1xf32> to vector<32x128xf32>
    %5 = arith.addf %2, %4 : vector<32x128xf32>
    %cst_5 = arith.constant 0.000000e+00 : f32
    %6 = vector.broadcast %cst_5 : f32 to vector<32x128xf32>
    %7 = arith.maximumf %5, %6 : vector<32x128xf32>
    %c0_6 = arith.constant 0 : index
    %c0_7 = arith.constant 0 : index
    %8 = vector.load %arg4[%c0_6, %c0_7] : memref<16x32xf32, #tpu.memory_space<vmem>>, vector<16x32xf32>
    %cst_8 = arith.constant dense<0.000000e+00> : vector<16x128xf32>
    %9 = tpu.matmul %8, %7, %cst_8 {dimension_numbers = #tpu.dot_dimension_numbers<[1], [0], [0], [1], [0, 0, 1, 1], [], []>} : vector<16x32xf32>, vector<32x128xf32>, vector<16x128xf32> -> vector<16x128xf32>
    %c0_9 = arith.constant 0 : index
    %c0_10 = arith.constant 0 : index
    %10 = vector.load %arg5[%c0_9, %c0_10] : memref<16x1xf32, #tpu.memory_space<vmem>>, vector<16x1xf32>
    %11 = vector.broadcast %10 : vector<16x1xf32> to vector<16x128xf32>
    %12 = arith.addf %9, %11 : vector<16x128xf32>
    %c0_11 = arith.constant 0 : index
    %c0_12 = arith.constant 0 : index
    %13 = vector.load %arg6[%c0_11, %c0_12] : memref<16x128xf32, #tpu.memory_space<vmem>>, vector<16x128xf32>
    %cst_13 = arith.constant 9.99999968E-21 : f32
    %14 = vector.broadcast %cst_13 : f32 to vector<16x128xf32>
    %15 = arith.addf %13, %14 : vector<16x128xf32>
    %16 = math.log %15 : vector<16x128xf32>
    %cst_14 = arith.constant 0.000000e+00 : f32
    %17 = vector.broadcast %cst_14 : f32 to vector<16x128xf32>
    %18 = arith.subf %17, %16 : vector<16x128xf32>
    %cst_15 = arith.constant 9.99999968E-21 : f32
    %19 = vector.broadcast %cst_15 : f32 to vector<16x128xf32>
    %20 = arith.addf %18, %19 : vector<16x128xf32>
    %21 = math.log %20 : vector<16x128xf32>
    %cst_16 = arith.constant -1.11111116 : f32
    %22 = vector.broadcast %cst_16 : f32 to vector<16x128xf32>
    %23 = arith.mulf %22, %21 : vector<16x128xf32>
    %24 = arith.addf %12, %23 : vector<16x128xf32>
    %cst_17 = arith.constant dense<0xFF800000> : vector<128xf32>
    %25 = vector.multi_reduction <maximumf>, %24, %cst_17 [0] : vector<16x128xf32> to vector<128xf32>
    %26 = vector.shape_cast %25 : vector<128xf32> to vector<1x128xf32>
    %27 = vector.broadcast %26 : vector<1x128xf32> to vector<16x128xf32>
    %28 = arith.subf %24, %27 : vector<16x128xf32>
    %29 = math.exp %28 : vector<16x128xf32>
    %cst_18 = arith.constant dense<0.000000e+00> : vector<128xf32>
    %30 = vector.multi_reduction <add>, %29, %cst_18 [0] : vector<16x128xf32> to vector<128xf32>
    %31 = vector.shape_cast %30 : vector<128xf32> to vector<1x128xf32>
    %32 = vector.broadcast %31 : vector<1x128xf32> to vector<16x128xf32>
    %33 = arith.divf %29, %32 : vector<16x128xf32>
    %c0_19 = arith.constant 0 : index
    %c0_20 = arith.constant 0 : index
    %34 = vector.load %arg7[%c0_19, %c0_20] : memref<16x128xf32, #tpu.memory_space<vmem>>, vector<16x128xf32>
    tpu.vector_store %arg7[%c0_19, %c0_20], %33 {strides = array<i32>} : memref<16x128xf32, #tpu.memory_space<vmem>>, vector<16x128xf32>,
    return
  }
  func.func @transform_0(%arg0: i32) -> (i32, i32) {
    %c0_i32 = arith.constant 0 : i32
    %c0_i32_0 = arith.constant 0 : i32
    return %c0_i32, %arg0 : i32, i32
  }
  func.func @transform_1(%arg0: i32) -> (i32, i32) {
    %c0_i32 = arith.constant 0 : i32
    %c0_i32_0 = arith.constant 0 : i32
    %c0_i32_1 = arith.constant 0 : i32
    return %c0_i32, %c0_i32_0 : i32, i32
  }
  func.func @transform_2(%arg0: i32) -> (i32, i32) {
    %c0_i32 = arith.constant 0 : i32
    %c0_i32_0 = arith.constant 0 : i32
    %c0_i32_1 = arith.constant 0 : i32
    return %c0_i32, %c0_i32_0 : i32, i32
  }
  func.func @transform_3(%arg0: i32) -> (i32, i32) {
    %c0_i32 = arith.constant 0 : i32
    %c0_i32_0 = arith.constant 0 : i32
    %c0_i32_1 = arith.constant 0 : i32
    return %c0_i32, %c0_i32_0 : i32, i32
  }
  func.func @transform_4(%arg0: i32) -> (i32, i32) {
    %c0_i32 = arith.constant 0 : i32
    %c0_i32_0 = arith.constant 0 : i32
    %c0_i32_1 = arith.constant 0 : i32
    return %c0_i32, %c0_i32_0 : i32, i32
  }
  func.func @transform_5(%arg0: i32) -> (i32, i32) {
    %c0_i32 = arith.constant 0 : i32
    %c0_i32_0 = arith.constant 0 : i32
    return %c0_i32, %arg0 : i32, i32
  }
  func.func @transform_6(%arg0: i32) -> (i32, i32) {
    %c0_i32 = arith.constant 0 : i32
    %c0_i32_0 = arith.constant 0 : i32
    return %c0_i32, %arg0 : i32, i32
  }
}

</mosaic_0001>

<bundles_post_ra>
// kernel: tpu_custom_call.1
= control target key start
LH: loop header
LB: loop body
LE: loop exit
PB: predicated region body
PF: predicated region fallthrough
CT: control target
= control target key end

     0   :  { %v281_v3 = vmov 0   ;;  %vm55_vm0 = vcmask 195584   ;;  %s378_s0 = inlined_call_operand.vmem [shape: f32[24,128], index: 0, kind: input, shape index: {}]   ;;  %s379_s1 = inlined_call_operand.vmem [shape: f32[32,24], index: 1, kind: input, shape index: {}]   ;;  %s380_s2 = inlined_call_operand.vmem [shape: f32[32,1], index: 2, kind: input, shape index: {}]   ;;  %s381_s3 = inlined_call_operand.vmem [shape: f32[16,32], index: 3, kind: input, shape index: {}]   ;;  %s382_s4 = inlined_call_operand.vmem [shape: f32[16,1], index: 4, kind: input, shape index: {}]   ;;  %s383_s5 = inlined_call_operand.vmem [shape: f32[16,128], index: 5, kind: input, shape index: {}]   ;;  %s384_s6 = inlined_call_operand.hbm [shape: f32[16,128], index: 6, kind: output, shape index: {}]  }
   0x1   :  { %v26_v0 = vld [vmem:[%s378_s0 + $0x10] sm:$0xff]  ;;  %v25_v1 = vld [vmem:[%s378_s0 + $0x8] sm:$0xff]  ;;  %v24_v2 = vld [vmem:[%s378_s0] sm:$0xff]  ;;  %238 = vset.pattern.permute.xlu0 %v281_v3  ;;  %239 = vset.pattern.permute.xlu1 %v281_v3 }
   0x2   :  { %227 = vmatpush.msra.mxu2 %v26_v0  ;;  %81 = vmatpush.msra.mxu0 %v26_v0  ;;  %v34_v4 = vld [vmem:[%s380_s2 + $0x18] sm:$0xff]  ;;  %v32_v5 = vld [vmem:[%s380_s2 + $0x8] sm:$0xff]  ;;  %v29_v6 = vld [vmem:[%s379_s1 + $0x10] sm:$0xff] }
   0x3   :  { %v27_v7 = vld [vmem:[%s379_s1] sm:$0xff] }
   0x4   :  { %228 = vmatpush.msra.mxu2 %v25_v1  ;;  %82 = vmatpush.msra.mxu0 %v25_v1 }
   0x5   :  { %11 = vsyncpa [#allocation3], 0  ;;  %52 = vperm.xlu0 %238, %v34_v4   ;;  %42 = vperm.xlu1 %239, %v32_v5   ;;  %v33_v8 = vld [vmem:[%s380_s2 + $0x10] sm:$0xff]  ;;  %v31_v9 = vld [vmem:[%s380_s2] sm:$0xff]  ;;  %vm115_vm1 = vcmask 261120   ;;  %s209_s29 = sshll.u32 %s384_s6, 4  ;;  %s210_s29 = int_to_ptr.hbm [resolvable:$true] %s209_s29 }
   0x6   :  { %229 = vmatpush.msra.mxu2 %v24_v2  ;;  %83 = vmatpush.msra.mxu0 %v24_v2  ;;  %v30_v10 = vld [vmem:[%s379_s1 + $0x18] sm:$0xff]  ;;  %v28_v11 = vld [vmem:[%s379_s1 + $0x8] sm:$0xff]  ;;  %v103_v12 = vld [vmem:[%s382_s4] sm:$0xff]  ;;  %s283_s30 = smov 128   ;;  %s284_s7 = smov 8  }
   0x7   :  { %223 = vmatmul.msk.f32.vlgmr.msra.gmra.mxu2 %vm55_vm0, %v29_v6  ;;  %221 = vmatmul.msk.f32.vlgmr.msra.gmra.mxu0 %vm55_vm0, %v27_v7  ;;  %v104_v13 = vld [vmem:[%s382_s4 + $0x8] sm:$0xff]  ;;  %v101_v30 = vld [vmem:[%s381_s3] sm:$0xff] }
   0x8   :  { %240 = vset.pattern.permute.xlu2 %v281_v3  ;;  %v102_v31 = vld [vmem:[%s381_s3 + $0x8] sm:$0xff]  ;;  %v145_v32 = vld [vmem:[%s383_s5] sm:$0xff]  ;;  %s282_s3 = smov [#allocation2]  }
   0x9   :  { %107 = vperm.xlu2 %240, %v103_v12   ;;  %v146_v33 = vld [vmem:[%s383_s5 + $0x8] sm:$0xff]  ;;  %v147_v34 = vadd.f32 1e-20, %v145_v32  ;;  %s207_s5 = sshll.u32 %s282_s3, 4  ;;  %s208_s5 = int_to_ptr.vmem [resolvable:$true] %s207_s5 }
   0xa   :  { %v148_v35 = vadd.f32 1e-20, %v146_v33 }
   0xb   :  { %241 = vlog2.f32 %v147_v34 }
   0xc   :  { %243 = vlog2.f32 %v148_v35 }
   0xd   :  { %47 = vperm.xlu0 %238, %v33_v8   ;;  %37 = vperm.xlu1 %239, %v31_v9  }
   0xf   :  { %224 = vmatmul.msk.f32.gmra.mxu2 %vm55_vm0, %v30_v10  ;;  %222 = vmatmul.msk.f32.gmra.mxu0 %vm55_vm0, %v28_v11 }
  0x11   :  { %112 = vperm.xlu2 %240, %v104_v13   ;;  %v242_v36 = vpop.eup %241 }
  0x12   :  { %v244_v37 = vpop.eup %243  ;;  %v150_v38 = vmul.f32 0.6931472, %v242_v36 }
  0x13   :  { %v152_v39 = vmul.f32 0.6931472, %v244_v37 }
  0x14   :  { %v153_v40 = vsub.f32 0.0, %v150_v38 }
  0x15   :  { %v154_v41 = vsub.f32 0.0, %v152_v39 }
  0x16   :  { %v155_v42 = vadd.f32 1e-20, %v153_v40 }
  0x17   :  { %v156_v43 = vadd.f32 1e-20, %v154_v41 }
  0x18   :  { %245 = vlog2.f32 %v155_v42 }
  0x19   :  { %247 = vlog2.f32 %v156_v43 }
  0x1e   :  { %v246_v45 = vpop.eup %245 }
  0x1f   :  { %v248_v46 = vpop.eup %247  ;;  %v158_v47 = vmul.f32 0.6931472, %v246_v45 }
  0x20   :  { %v160_v48 = vmul.f32 0.6931472, %v248_v46 }
  0x21   :  { %v161_v51 = vmul.f32 -1.1111112, %v158_v47 }
  0x22   :  { %v162_v52 = vmul.f32 -1.1111112, %v160_v48 }
  0x63   :  { %v108_v44 = vpop.permute.xlu2 %107 }
  0x6b   :  { %v113_v53 = vpop.permute.xlu2 %112 }
  0x77   :  { %v53_v14 = vpop.permute.xlu0 %52  ;;  %v43_v16 = vpop.permute.xlu1 %42 }
  0x7f   :  { %v48_v18 = vpop.permute.xlu0 %47  ;;  %v38_v23 = vpop.permute.xlu1 %37 }
  0x84   :  { %v85_v15 = vpop.f32.mrf.mxu0 }
  0x85   :  { %v86_v27 = vadd.f32 %v85_v15, %v38_v23 }
  0x87   :  { %v97_v29 = vmax.f32 %v86_v27, 0.0 }
  0x8a   :  { %v91_v17 = vpop.f32.mrf.mxu2 }
  0x8b   :  { %v92_v21 = vadd.f32 %v91_v17, %v48_v18 }
  0x8c   :  { %v88_v19 = vpop.f32.mrf.mxu0 }
  0x8d   :  { %v89_v24 = vadd.f32 %v88_v19, %v43_v16  ;;  %v99_v26 = vmax.f32 %v92_v21, 0.0 }
  0x8f   :  { %v98_v28 = vmax.f32 %v89_v24, 0.0 }
  0x92   :  { %v94_v20 = vpop.f32.mrf.mxu2 }
  0x93   :  { %v95_v22 = vadd.f32 %v94_v20, %v53_v14 }
  0x95   :  { %v100_v25 = vmax.f32 %v95_v22, 0.0 }
  0x97   :  { %134 = vmatpush.msra.mxu1 %v100_v25  ;;  %230 = vmatpush.msra.mxu3 %v100_v25 }
  0x99   :  { %135 = vmatpush.msra.mxu1 %v99_v26  ;;  %231 = vmatpush.msra.mxu3 %v99_v26 }
  0x9b   :  { %136 = vmatpush.msra.mxu1 %v98_v28  ;;  %232 = vmatpush.msra.mxu3 %v98_v28 }
  0x9d   :  { %137 = vmatpush.msra.mxu1 %v97_v29  ;;  %233 = vmatpush.msra.mxu3 %v97_v29 }
  0x9e   :  { %225 = vmatmul.msk.f32.vlgmr.msra.gmra.mxu1 %vm115_vm1, %v101_v30  ;;  %226 = vmatmul.msk.f32.vlgmr.msra.gmra.mxu3 %vm115_vm1, %v102_v31 }
 0x11b   :  { %v139_v49 = vpop.f32.mrf.mxu1 }
 0x11c   :  { %v140_v50 = vadd.f32 %v139_v49, %v108_v44 }
 0x11e   :  { %v163_v56 = vadd.f32 %v161_v51, %v140_v50 }
 0x121   :  { %v142_v54 = vpop.f32.mrf.mxu3 }
 0x122   :  { %v143_v55 = vadd.f32 %v142_v54, %v113_v53 }
 0x124   :  { %v164_v57 = vadd.f32 %v162_v52, %v143_v55 }
 0x126   :  { %v165_v58 = vmax.f32 %v163_v56, %v164_v57 }
 0x128   :  { %v166_v59 = vrot.slane %v165_v58, 4 }
 0x12a   :  { %v167_v60 = vmax.f32 %v165_v58, %v166_v59 }
 0x12c   :  { %v168_v61 = vrot.slane %v167_v60, 2 }
 0x12e   :  { %v169_v62 = vmax.f32 %v167_v60, %v168_v61 }
 0x130   :  { %v170_v63 = vrot.slane %v169_v62, 1 }
 0x132   :  { %v171_v0 = vmax.f32 %v169_v62, %v170_v63 }
 0x134   :  { %v172_v1 = vsub.f32 %v163_v56, %v171_v0  ;;  %v173_v2 = vsub.f32 %v164_v57, %v171_v0 }
 0x136   :  { %v174_v3 = vmul.f32 1.442695, %v172_v1  ;;  %v176_v4 = vmul.f32 1.442695, %v173_v2 }
 0x138   :  { %249 = vpow2.f32 %v174_v3 }
 0x139   :  { %251 = vpow2.f32 %v176_v4 }
 0x13e   :  { %v250_v5 = vpop.eup %249 }
 0x13f   :  { %v252_v6 = vpop.eup %251 }
 0x140   :  { %v178_v7 = vadd.f32 %v252_v6, %v250_v5 }
 0x142   :  { %v179_v8 = vrot.slane %v178_v7, 4 }
 0x144   :  { %v180_v9 = vadd.f32 %v179_v8, %v178_v7 }
 0x146   :  { %v181_v10 = vrot.slane %v180_v9, 2 }
 0x148   :  { %v182_v11 = vadd.f32 %v181_v10, %v180_v9 }
 0x14a   :  { %v183_v12 = vrot.slane %v182_v11, 1 }
 0x14c   :  { %v184_v13 = vadd.f32 %v183_v12, %v182_v11 }
 0x14e   :  { %253 = vrcp.f32 %v184_v13  ;;  %v196_v17 = vand.u32 2147483648, %v184_v13  ;;  %v194_v19 = vand.u32 2147483647, %v184_v13  ;;  %vm190_vm3 = vweird.f32 %v184_v13 }
 0x150   :  { %v197_v21 = vor.u32 1.1754944e-38, %v196_v17  ;;  %vm195_vm5 = vcmp.eq.f32.partialorder %v194_v19, 8.507059e+37 }
 0x154   :  { %v254_v14 = vpop.eup %253 }
 0x155   :  { %v186_v15 = vmul.f32 %v254_v14, %v184_v13  ;;  %vm191_vm2 = vweird.f32 %v254_v14 }
 0x156   :  { %vm192_vm4 = vmor %vm190_vm3, %vm191_vm2 }
 0x157   :  { %v187_v16 = vsub.f32 1.0, %v186_v15 }
 0x159   :  { %v188_v18 = vmul.f32 %v254_v14, %v187_v16 }
 0x15b   :  { %v189_v20 = vadd.f32 %v254_v14, %v188_v18 }
 0x15d   :  { %v193_v22 = vsel %vm192_vm4, %v254_v14, %v189_v20 }
 0x15e   :  { %v198_v23 = vsel %vm195_vm5, %v197_v21, %v193_v22 }
 0x15f   :  { %v199_v24 = vmul.f32 %v250_v5, %v198_v23  ;;  %v200_v25 = vmul.f32 %v252_v6, %v198_v23 }
 0x161   :  { %201 = vst [vmem:[#allocation2] sm:$0xff] %v199_v24 }
 0x162   :  { %202 = vst [vmem:[#allocation2 + $0x8] sm:$0xff] %v200_v25 }
 0x163   :  { %215 = dma.vmem_to_hbm [thread:$0]  %s208_s5, 256, %s210_s29, [#allocation3], %s283_s30, %s283_s30, %s284_s7  }
 0x164   :  { %279 = dma.done.wait [#allocation3], 256  }
 0x165   :  { %280 = vsyncadd [#allocation3], 4294967040 }
 0x166   :  { %220 = vsyncpa [#allocation3], 1 }

</bundles_post_ra>
